<compile_context>
chip_gen: v5e
topology: v5e:2x2
jax: 0.10.0
libtpu: 0.0.40
codegen_flags: <defaults>
</compile_context>

<pallas_src>
import numpy as np
import jax
import jax.numpy as jnp
from jax import lax
from jax.experimental import pallas as pl
from jax.experimental.pallas import tpu as pltpu


def _round_up(x, m):
    return (x + m - 1) // m * m


def _vmem_capacity_bytes():
    try:
        info = pltpu.get_tpu_info()
        cap = getattr(info, "vmem_capacity_bytes", None)
        if cap:
            return int(cap)
    except Exception:
        pass
    return 64 * 2**20          # conservative default (v7x per-TC VMEM)


# --------------------- fused kernel: MLP (recomputed) + scores tile ---------------------

def _fused_mlp_scores_kernel(x_ref, w1_ref, b1_ref, w2_ref, b2_ref, w3_ref, b3_ref,
                             e_ref, out_ref):
    # 3-layer MLP on the (small) x block; VPU/MXU work hides under the E-tile DMA.
    h = jnp.dot(x_ref[...], w1_ref[...], preferred_element_type=jnp.float32) + b1_ref[...]
    h = jnp.maximum(h, 0.0)
    h = jnp.dot(h, w2_ref[...], preferred_element_type=jnp.float32) + b2_ref[...]
    h = jnp.maximum(h, 0.0)
    h = jnp.dot(h, w3_ref[...], preferred_element_type=jnp.float32) + b3_ref[...]
    h = h.astype(e_ref.dtype)                      # bf16 for the MXU
    # scores tile = h @ E_tile^T, contracted on E's native last (emb) dim (no transpose).
    out_ref[...] = lax.dot_general(
        h, e_ref[...],
        dimension_numbers=(((1,), (1,)), ((), ())),
        preferred_element_type=jnp.float32).astype(out_ref.dtype)


# --------------------------------- tiling / preparation ---------------------------------

def plan_entity_tiling(n_ent, tile_n=2048):
    """Pick an entity tile (multiple of 128) that bounds padding waste."""
    tile_n = min(tile_n, _round_up(n_ent, 128))
    num_tiles = -(-n_ent // tile_n)
    tile_n = _round_up(-(-n_ent // num_tiles), 128)
    n_pad = num_tiles * tile_n
    return tile_n, n_pad


def prepare_entity_table(eemb, tile_n=2048):
    """One-time prep (do at model init, NOT per forward): cast the entity embedding
    table to bf16 and pad to a whole number of entity tiles."""
    n_ent = eemb.shape[0]
    tile_n, n_pad = plan_entity_tiling(n_ent, tile_n)
    e = eemb.astype(jnp.bfloat16)
    if n_pad != n_ent:
        e = jnp.pad(e, ((0, n_pad - n_ent), (0, 0)))
    return e, tile_n
    # TODO(synk): for production emb < 128, pre-pack E lane-dense (minor dim 128) to
    # avoid dead lanes in the (16,128) bf16 tiles of the streamed E buffer.


# --------------------------------------- wrapper -----------------------------------------

def base_model_forward(x, w1, b1, w2, b2, w3, b3, e_prepared, n_ent, tile_n,
                       *, out_dtype=jnp.float32):
    """x: [B, emb] (already-gathered relation embeddings, possibly + head embeddings);
    e_prepared/tile_n from prepare_entity_table(). Returns scores [B, n_ent]."""
    b, emb = x.shape
    n_pad = e_prepared.shape[0]
    assert n_pad % tile_n == 0
    n_tiles = n_pad // tile_n

    # Batch padding: multiple of 16 (bf16 packs 16 rows/sublane tile on the MXU LHS).
    b_pad = _round_up(max(b, 16), 16)
    b_block = b_pad
    if b_pad > 512:                       # block B for large batches (v7x VMEM)
        b_block = 256
        b_pad = _round_up(b_pad, b_block)
    if b_pad != b:
        x = jnp.pad(x, ((0, b_pad - b), (0, 0)))

    # Generation-aware VMEM budget with lane-padded buffer sizes.
    cap = _vmem_capacity_bytes()
    budget = int(0.70 * cap)
    emb_l = _round_up(emb, 128)
    h1, h2 = w1.shape[1], w2.shape[1]
    h1_l, h2_l = _round_up(h1, 128), _round_up(h2, 128)
    out_bytes = jnp.dtype(out_dtype).itemsize
    w_bytes = 4 * (_round_up(emb, 8) * h1_l + _round_up(h1, 8) * h2_l
                   + _round_up(h2, 8) * emb_l + h1_l + h2_l + emb_l)

    def vmem_need(bb):
        return (2 * tile_n * emb_l * 2            # E tile (bf16), double-buffered
                + 2 * bb * tile_n * out_bytes     # output tile, double-buffered
                + 2 * bb * emb_l * 4              # x block (f32)
                + 2 * w_bytes                     # resident MLP weights/biases
                + (2 << 20))                      # compiler scratch margin

    # Fit VMEM by shrinking the B block (keeps entity tiles / DMAs long), not tile_n.
    while vmem_need(b_block) > budget and b_block > 16:
        b_block = max(16, b_block // 2)
    if b_pad % b_block:
        b_pad2 = _round_up(b_pad, b_block)
        x = jnp.pad(x, ((0, b_pad2 - b_pad), (0, 0)))
        b_pad = b_pad2
    b_tiles = b_pad // b_block

    need = vmem_need(b_block)
    vmem_limit = int(min(budget, max(16 * 2**20, 2 * need)))
    vmem_limit = max(vmem_limit, min(need, budget))

    steps = b_tiles * n_tiles
    mlp_flops = 2 * b_block * (emb * h1 + h1 * h2 + h2 * emb)
    flops = int(2 * b_pad * emb * n_pad + mlp_flops * steps)
    bytes_accessed = int(b_tiles * n_pad * emb * 2      # E stream (re-read per B block)
                         + b_pad * n_pad * out_bytes    # scores writeback
                         + b_pad * emb * 4)             # x

    const = lambda i, j: (0, 0)
    scores = pl.pallas_call(
        _fused_mlp_scores_kernel,
        out_shape=jax.ShapeDtypeStruct((b_pad, n_pad), out_dtype),
        grid_spec=pltpu.PrefetchScalarGridSpec(
            num_scalar_prefetch=0,
            grid=(b_tiles, n_tiles),
            in_specs=[
                pl.BlockSpec((b_block, emb), lambda i, j: (i, 0)),   # x block (resident per i)
                pl.BlockSpec(w1.shape, const),                       # weights/biases resident
                pl.BlockSpec(b1.shape, const),
                pl.BlockSpec(w2.shape, const),
                pl.BlockSpec(b2.shape, const),
                pl.BlockSpec(w3.shape, const),
                pl.BlockSpec(b3.shape, const),
                pl.BlockSpec((tile_n, emb), lambda i, j: (j, 0)),    # E tile streamed from HBM
            ],
            out_specs=pl.BlockSpec((b_block, tile_n), lambda i, j: (i, j)),
        ),
        compiler_params=pltpu.CompilerParams(
            dimension_semantics=("parallel", "parallel"),   # shards across TCs on v7x
            vmem_limit_bytes=vmem_limit),
        cost_estimate=pl.CostEstimate(
            flops=flops, transcendentals=0, bytes_accessed=bytes_accessed),
    )(x, w1, b1, w2, b2, w3, b3, e_prepared)

    # TODO(synk): emit bf16 scores (out_dtype=jnp.bfloat16) or fuse the downstream
    # log_softmax to halve the dominant writeback stream once precision is validated.
    return scores[:b, :n_ent]


# ---------------------------------------- test glue ---------------------------------------

def xavier_uniform(key, shape):
    fan_in, fan_out = shape[0], shape[1]
    bound = float(np.sqrt(6.0 / (fan_in + fan_out)))
    return jax.random.uniform(key, shape, jnp.float32, -bound, bound)


def reference_forward(x, w1, b1, w2, b2, w3, b3, eemb):
    h = jnp.maximum(x @ w1 + b1, 0.0)
    h = jnp.maximum(h @ w2 + b2, 0.0)
    h = h @ w3 + b3
    return h @ eemb.T


if __name__ == "__main__":
    # Small shapes consistent with the module's forward.
    B = 8            # batch of relation embeddings fed to forward()
    EMB = 32         # args['emb_size']
    H1 = 64          # args['hidden1']
    H2 = 48          # args['hidden2']
    N_ENT = 512      # entity vocabulary (rows of self.eemb.weight)
    N_REL = 64       # relation vocabulary (rows of self.remb.weight)

    key = jax.random.PRNGKey(0)
    k = jax.random.split(key, 10)

    # Embedding tables (xavier_uniform as in the module when no pretrain).
    eemb = xavier_uniform(k[0], (N_ENT, EMB))
    remb = xavier_uniform(k[1], (N_REL, EMB))

    # layers1 MLP weights stored pre-transposed as [in, out]; biases as [1, out].
    w1 = xavier_uniform(k[2], (EMB, H1))
    b1 = jax.random.uniform(k[3], (1, H1), jnp.float32, -0.1, 0.1)
    w2 = xavier_uniform(k[4], (H1, H2))
    b2 = jax.random.uniform(k[5], (1, H2), jnp.float32, -0.1, 0.1)
    w3 = xavier_uniform(k[6], (H2, EMB))
    b3 = jax.random.uniform(k[7], (1, EMB), jnp.float32, -0.1, 0.1)

    # One-time entity-table prep (hoisted out of the per-call path).
    # tile_n=128 -> 4 entity tiles at N_ENT=512, exercising the grid path.
    e_prepared, tile_n = prepare_entity_table(eemb, tile_n=128)

    # Input x = self.remb(rels): gather B relation embeddings (plain JAX; fusing the
    # gather via scalar prefetch only pays off at much larger B).
    rels = jax.random.randint(k[8], (B,), 0, N_REL)
    x = remb[rels]                      # [B, EMB]

    out = base_model_forward(x, w1, b1, w2, b2, w3, b3, e_prepared, N_ENT, tile_n)
    out = jax.block_until_ready(out)

    ref = reference_forward(x, w1, b1, w2, b2, w3, b3, eemb)
    # bf16 E / bf16 h with f32 accumulation -> loosened tolerance vs f32 reference.
    np.testing.assert_allclose(np.asarray(out), np.asarray(ref), rtol=2e-2, atol=2e-2)
    assert out.shape == (B, N_ENT)

    print("KERNEL_OK")
</pallas_src>

<mosaic_0001>
module attributes {stable_mosaic.version = 11 : i64} {
  func.func @_fused_mlp_scores_kernel(%arg0: i32, %arg1: i32, %arg2: memref<16x32xf32, #tpu.memory_space<vmem>>, %arg3: memref<32x64xf32, #tpu.memory_space<vmem>>, %arg4: memref<1x64xf32, #tpu.memory_space<vmem>>, %arg5: memref<64x48xf32, #tpu.memory_space<vmem>>, %arg6: memref<1x48xf32, #tpu.memory_space<vmem>>, %arg7: memref<48x32xf32, #tpu.memory_space<vmem>>, %arg8: memref<1x32xf32, #tpu.memory_space<vmem>>, %arg9: memref<128x32xbf16, #tpu.memory_space<vmem>>, %arg10: memref<16x128xf32, #tpu.memory_space<vmem>>) attributes {dimension_semantics = [#tpu.dimension_semantics<parallel>, #tpu.dimension_semantics<parallel>], iteration_bounds = array<i64: 1, 4>, scalar_prefetch = 0 : i64, scratch_operands = 0 : i64, tpu.core_type = #tpu.core_type<tc>, window_params = [{transform_indices = @transform_0, window_bounds = array<i64: 16, 32>}, {pipeline_mode = #tpu.pipeline_mode<synchronous>, transform_indices = @transform_1, window_bounds = array<i64: 32, 64>}, {pipeline_mode = #tpu.pipeline_mode<synchronous>, transform_indices = @transform_2, window_bounds = array<i64: 1, 64>}, {pipeline_mode = #tpu.pipeline_mode<synchronous>, transform_indices = @transform_3, window_bounds = array<i64: 64, 48>}, {pipeline_mode = #tpu.pipeline_mode<synchronous>, transform_indices = @transform_4, window_bounds = array<i64: 1, 48>}, {pipeline_mode = #tpu.pipeline_mode<synchronous>, transform_indices = @transform_5, window_bounds = array<i64: 48, 32>}, {pipeline_mode = #tpu.pipeline_mode<synchronous>, transform_indices = @transform_6, window_bounds = array<i64: 1, 32>}, {transform_indices = @transform_7, window_bounds = array<i64: 128, 32>}, {transform_indices = @transform_8, window_bounds = array<i64: 16, 128>}]} {
    %c0 = arith.constant 0 : index
    %c0_0 = arith.constant 0 : index
    %0 = vector.load %arg2[%c0, %c0_0] : memref<16x32xf32, #tpu.memory_space<vmem>>, vector<16x32xf32>
    %c0_1 = arith.constant 0 : index
    %c0_2 = arith.constant 0 : index
    %1 = vector.load %arg3[%c0_1, %c0_2] : memref<32x64xf32, #tpu.memory_space<vmem>>, vector<32x64xf32>
    %cst = arith.constant dense<0.000000e+00> : vector<16x64xf32>
    %2 = tpu.matmul %0, %1, %cst {dimension_numbers = #tpu.dot_dimension_numbers<[1], [0], [0], [1], [0, 0, 1, 1], [], []>} : vector<16x32xf32>, vector<32x64xf32>, vector<16x64xf32> -> vector<16x64xf32>
    %c0_3 = arith.constant 0 : index
    %c0_4 = arith.constant 0 : index
    %3 = vector.load %arg4[%c0_3, %c0_4] : memref<1x64xf32, #tpu.memory_space<vmem>>, vector<1x64xf32>
    %4 = vector.broadcast %3 : vector<1x64xf32> to vector<16x64xf32>
    %5 = arith.addf %2, %4 : vector<16x64xf32>
    %cst_5 = arith.constant 0.000000e+00 : f32
    %6 = vector.broadcast %cst_5 : f32 to vector<16x64xf32>
    %7 = arith.maximumf %5, %6 : vector<16x64xf32>
    %c0_6 = arith.constant 0 : index
    %c0_7 = arith.constant 0 : index
    %8 = vector.load %arg5[%c0_6, %c0_7] : memref<64x48xf32, #tpu.memory_space<vmem>>, vector<64x48xf32>
    %cst_8 = arith.constant dense<0.000000e+00> : vector<16x48xf32>
    %9 = tpu.matmul %7, %8, %cst_8 {dimension_numbers = #tpu.dot_dimension_numbers<[1], [0], [0], [1], [0, 0, 1, 1], [], []>} : vector<16x64xf32>, vector<64x48xf32>, vector<16x48xf32> -> vector<16x48xf32>
    %c0_9 = arith.constant 0 : index
    %c0_10 = arith.constant 0 : index
    %10 = vector.load %arg6[%c0_9, %c0_10] : memref<1x48xf32, #tpu.memory_space<vmem>>, vector<1x48xf32>
    %11 = vector.broadcast %10 : vector<1x48xf32> to vector<16x48xf32>
    %12 = arith.addf %9, %11 : vector<16x48xf32>
    %cst_11 = arith.constant 0.000000e+00 : f32
    %13 = vector.broadcast %cst_11 : f32 to vector<16x48xf32>
    %14 = arith.maximumf %12, %13 : vector<16x48xf32>
    %c0_12 = arith.constant 0 : index
    %c0_13 = arith.constant 0 : index
    %15 = vector.load %arg7[%c0_12, %c0_13] : memref<48x32xf32, #tpu.memory_space<vmem>>, vector<48x32xf32>
    %cst_14 = arith.constant dense<0.000000e+00> : vector<16x32xf32>
    %16 = tpu.matmul %14, %15, %cst_14 {dimension_numbers = #tpu.dot_dimension_numbers<[1], [0], [0], [1], [0, 0, 1, 1], [], []>} : vector<16x48xf32>, vector<48x32xf32>, vector<16x32xf32> -> vector<16x32xf32>
    %c0_15 = arith.constant 0 : index
    %c0_16 = arith.constant 0 : index
    %17 = vector.load %arg8[%c0_15, %c0_16] : memref<1x32xf32, #tpu.memory_space<vmem>>, vector<1x32xf32>
    %18 = vector.broadcast %17 : vector<1x32xf32> to vector<16x32xf32>
    %19 = arith.addf %16, %18 : vector<16x32xf32>
    %20 = arith.truncf %19 : vector<16x32xf32> to vector<16x32xbf16>
    %c0_17 = arith.constant 0 : index
    %c0_18 = arith.constant 0 : index
    %21 = vector.load %arg9[%c0_17, %c0_18] : memref<128x32xbf16, #tpu.memory_space<vmem>>, vector<128x32xbf16>
    %cst_19 = arith.constant dense<0.000000e+00> : vector<16x128xf32>
    %22 = tpu.matmul %20, %21, %cst_19 {dimension_numbers = #tpu.dot_dimension_numbers<[1], [1], [0], [0], [0, 0, 1, 0], [], []>} : vector<16x32xbf16>, vector<128x32xbf16>, vector<16x128xf32> -> vector<16x128xf32>
    %c0_20 = arith.constant 0 : index
    %c0_21 = arith.constant 0 : index
    %23 = vector.load %arg10[%c0_20, %c0_21] : memref<16x128xf32, #tpu.memory_space<vmem>>, vector<16x128xf32>
    tpu.vector_store %arg10[%c0_20, %c0_21], %22 {strides = array<i32>} : memref<16x128xf32, #tpu.memory_space<vmem>>, vector<16x128xf32>,
    return
  }
  func.func @transform_0(%arg0: i32, %arg1: i32) -> (i32, i32) {
    %c0_i32 = arith.constant 0 : i32
    %c0_i32_0 = arith.constant 0 : i32
    return %arg0, %c0_i32 : i32, i32
  }
  func.func @transform_1(%arg0: i32, %arg1: i32) -> (i32, i32) {
    %c0_i32 = arith.constant 0 : i32
    %c0_i32_0 = arith.constant 0 : i32
    %c0_i32_1 = arith.constant 0 : i32
    return %c0_i32, %c0_i32_0 : i32, i32
  }
  func.func @transform_2(%arg0: i32, %arg1: i32) -> (i32, i32) {
    %c0_i32 = arith.constant 0 : i32
    %c0_i32_0 = arith.constant 0 : i32
    %c0_i32_1 = arith.constant 0 : i32
    return %c0_i32, %c0_i32_0 : i32, i32
  }
  func.func @transform_3(%arg0: i32, %arg1: i32) -> (i32, i32) {
    %c0_i32 = arith.constant 0 : i32
    %c0_i32_0 = arith.constant 0 : i32
    %c0_i32_1 = arith.constant 0 : i32
    return %c0_i32, %c0_i32_0 : i32, i32
  }
  func.func @transform_4(%arg0: i32, %arg1: i32) -> (i32, i32) {
    %c0_i32 = arith.constant 0 : i32
    %c0_i32_0 = arith.constant 0 : i32
    %c0_i32_1 = arith.constant 0 : i32
    return %c0_i32, %c0_i32_0 : i32, i32
  }
  func.func @transform_5(%arg0: i32, %arg1: i32) -> (i32, i32) {
    %c0_i32 = arith.constant 0 : i32
    %c0_i32_0 = arith.constant 0 : i32
    %c0_i32_1 = arith.constant 0 : i32
    return %c0_i32, %c0_i32_0 : i32, i32
  }
  func.func @transform_6(%arg0: i32, %arg1: i32) -> (i32, i32) {
    %c0_i32 = arith.constant 0 : i32
    %c0_i32_0 = arith.constant 0 : i32
    %c0_i32_1 = arith.constant 0 : i32
    return %c0_i32, %c0_i32_0 : i32, i32
  }
  func.func @transform_7(%arg0: i32, %arg1: i32) -> (i32, i32) {
    %c0_i32 = arith.constant 0 : i32
    %c0_i32_0 = arith.constant 0 : i32
    return %arg1, %c0_i32 : i32, i32
  }
  func.func @transform_8(%arg0: i32, %arg1: i32) -> (i32, i32) {
    %c0_i32 = arith.constant 0 : i32
    return %arg0, %arg1 : i32, i32
  }
}

</mosaic_0001>

<bundles_post_ra>
// kernel: tpu_custom_call.1
= control target key start
LH: loop header
LB: loop body
LE: loop exit
PB: predicated region body
PF: predicated region fallthrough
CT: control target
= control target key end

     0   :  { %s1109_s0 = inlined_call_operand.vmem [shape: f32[16,32], index: 0, kind: input, shape index: {}]   ;;  %s1110_s1 = inlined_call_operand.vmem [shape: f32[32,64], index: 1, kind: input, shape index: {}]   ;;  %s1111_s2 = inlined_call_operand.vmem [shape: f32[1,64], index: 2, kind: input, shape index: {}]   ;;  %s1112_s3 = inlined_call_operand.vmem [shape: f32[64,48], index: 3, kind: input, shape index: {}]   ;;  %s1113_s4 = inlined_call_operand.vmem [shape: f32[1,48], index: 4, kind: input, shape index: {}]   ;;  %s1114_s5 = inlined_call_operand.vmem [shape: f32[48,32], index: 5, kind: input, shape index: {}]   ;;  %s1115_s6 = inlined_call_operand.vmem [shape: f32[1,32], index: 6, kind: input, shape index: {}]   ;;  %s1116_s7 = inlined_call_operand.vmem [shape: bf16[512,32], index: 7, kind: input, shape index: {}]   ;;  %s1117_s8 = inlined_call_operand.hbm [shape: f32[16,512], index: 8, kind: output, shape index: {}]  }
   0x1   :  { %1118 = sst [smem:[#allocation5_spill]] %s1109_s0 }
   0x2   :  { %13 = vsyncpa [#allocation3], 0 }
   0x3   :  { %15 = vsyncpa [#allocation3 + $0x1], 0  ;;  %s923_s27 = smov 0   ;;  %s925_s28 = smov 0  }
   0x4   :  { %s927_s29 = smov 0   ;;  %s929_s30 = smov 0  }
   0x5   :  { %s931_s9 = smov 0   ;;  %s933_s10 = smov 0  }
   0x6 LB: > { %s674_s11 = sadd.s32 4294967295, %s873_s10   ;;  %s675_s12 = sadd.s32 4294967294, %s873_s10   ;;  %s873_s10 = sphi %s933_s10, %s21_s10   ;;  %s869_s9 = sphi %s931_s9, %s1126_s9   ;;  %s865_s30 = sphi %s929_s30, %s1125_s30   ;;  %s861_s29 = sphi %s927_s29, %s1124_s29   ;;  %s857_s28 = sphi %s925_s28, %s1123_s28   ;;  %s853_s27 = sphi %s923_s27, %s1122_s27  }
   0x7   : > { %s30_s13 = sadd.s32 1, %s869_s9  ;;  %s220_s14 = sadd.s32 1, %s861_s29 }
   0x8   : > { %p31_p0 = scmp.ge.s32.totalorder %s30_s13, 4  ;;  %p230_p1 = scmp.ne.s32.totalorder %s861_s29, %s857_s28 }
   0x9   : > { %p231_p2 = scmp.eq.s32.totalorder %s674_s11, 3  ;;  %p236_p3 = scmp.ne.s32.totalorder %s857_s28, %s853_s27 }
   0xa   : > { %s1128_s13 = smov (%p31_p0, %s30_s13), 0  ;;  %p237_p5 = scmp.eq.s32.totalorder %s675_s12, 3 }
   0xb   : > { %p963_p4 = por %p231_p2, %p230_p1  ;;  %s216_s16 = ssub.s32 %s869_s9, %s1128_s13 }
   0xc   : > { %p679_p6 = scmp.ge.s32.totalorder %s873_s10, 1  ;;  %p218_p7 = scmp.eq.s32.totalorder %s216_s16, 0 }
   0xd   : > { %p970_p8 = por %p237_p5, %p236_p3  ;;  %p291_p9 = scmp.lt.s32.totalorder %s873_s10, 5 }
   0xe   : > { %s976_s18 = scalar_select %p218_p7, %s861_s29, %s220_s14  }
   0xf   : > { %p292_p10 = pnand %p679_p6, %p291_p9 }
  0x10   : > { %s1121_s0 = sld [smem:[#allocation5_spill]] (!%p292_p10)  ;;  %s681_s19 = sshll.u32 (!%p292_p10), %s865_s30, 4 }
  0x11   : > { %295 = sbr.rel (%p292_p10) target bundleno = 579 (0x243), region = 52  ;;  %p337_p11 = scmp.lt.s32.totalorder (!%p292_p10), %s681_s19, 63 }
  0x12   : > { %s327_s22 = sand.u32 (!%p292_p10), 1, %s857_s28   ;;  %s723_s24 = sshll.u32 (!%p292_p10), %s865_s30, 3 }
  0x13   : > { %s680_s23 = sshll.u32 (!%p292_p10), %s327_s22, 4  ;;  %s583_s11 = scalar_lea.hbm (!%p292_p10), %s1117_s8, %s723_s24 }
  0x14   : > { %s329_s12 = scalar_lea.vmem (!%p292_p10), [#allocation2], %s680_s23  ;;  %s586_s16 = sshll.u32 (!%p292_p10), %s583_s11, 4  ;;  %s587_s16 = int_to_ptr.hbm [resolvable:$true] %s586_s16 }
  0x15   : > { %s809_s20 = sshra.s32 (!%p292_p10), %s587_s16, 4  ;;  %s815_s24 = scalar_lea.hbm (!%p292_p10), %s1117_s8, 64  ;;  %s810_s20 = int_to_ptr.hbm [resolvable:$true] %s809_s20 }
  0x16   : > { %v348_v0 = vld [vmem:[%s1110_s1 + $0x18] sm:$0xff]  ;;  %v347_v1 = vld [vmem:[%s1110_s1 + $0x10] sm:$0xff]  ;;  %v346_v2 = vld [vmem:[%s1110_s1 + $0x8] sm:$0xff]  ;;  %vm353_vm0 = vcmask 261120   ;;  %vm397_vm1 = vcmask 523264   ;;  %s1130_s19 = smov (!%p337_p11, %s681_s19), 63  ;;  %p816_p1 = scmp.lt.s32.totalorder %s810_s20, %s1117_s8 }
  0x17   : > { %372 = vmatpush.msra.mxu0 %v348_v0  ;;  %v392_v3 = vld [vmem:[%s1112_s3 + $0x38] sm:$0xff]  ;;  %v391_v4 = vld [vmem:[%s1112_s3 + $0x30] sm:$0xff]  ;;  %v345_v5 = vld [vmem:[%s1110_s1] sm:$0xff]  ;;  %s682_s26 = sshll.u32 %s1130_s19, 2  ;;  %vm439_vm2 = vcmask 392192   ;;  %s570_s19 = scalar_lea.sflag [#allocation3], %s327_s22 }
  0x18   : > { %412 = vmatpush.msra.mxu1 %v392_v3  ;;  %v390_v6 = vld [vmem:[%s1112_s3 + $0x28] sm:$0xff]  ;;  %v343_v7 = vld [vmem:[%s1121_s0] sm:$0xff]  ;;  %v388_v9 = vld [vmem:[%s1112_s3 + $0x18] sm:$0xff]  ;;  %s1047_s14 = scalar_lea.vmem %s1116_s7, %s682_s26  ;;  %s811_s21 = scalar_lea.hbm %s810_s20, 16 }
  0x19   : > { %373 = vmatpush.msra.mxu0 %v347_v1  ;;  %v389_v8 = vld [vmem:[%s1112_s3 + $0x20] sm:$0xff]  ;;  %v344_v10 = vld [vmem:[%s1121_s0 + $0x8] sm:$0xff]  ;;  %v387_v11 = vld [vmem:[%s1112_s3 + $0x10] sm:$0xff]  ;;  %p812_p12 = scmp.ne.s32.totalorder %s810_s20, %s811_s21  ;;  %p817_p2 = scmp.lt.s32.totalorder %s815_s24, %s811_s21 }
  0x1a   : > { %413 = vmatpush.msra.mxu1 %v391_v4  ;;  %v386_v12 = vld [vmem:[%s1112_s3 + $0x8] sm:$0xff]  ;;  %v385_v13 = vld [vmem:[%s1112_s3] sm:$0xff]  ;;  %v432_v16 = vld [vmem:[%s1114_s5 + $0x18] sm:$0xff] }
  0x1b   : > { %374 = vmatpush.msra.mxu0 %v346_v2  ;;  %v434_v14 = vld [vmem:[%s1114_s5 + $0x28] sm:$0xff]  ;;  %v433_v15 = vld [vmem:[%s1114_s5 + $0x20] sm:$0xff]  ;;  %v431_v24 = vld [vmem:[%s1114_s5 + $0x10] sm:$0xff]  ;;  %p813_p13 = pnand %p812_p12, %p963_p4  ;;  %p818_p3 = por %p817_p2, %p816_p1 }
  0x1c   : > { %414 = vmatpush.msra.mxu1 %v390_v6  ;;  %456 = vmatpush.msra.mxu2 %v434_v14  ;;  %v792_v17 = vld [vmem:[%s1111_s2] ss:$0 sm:$0xff]  ;;  %v430_v25 = vld [vmem:[%s1114_s5 + $0x8] sm:$0xff]  ;;  %v733_v27 = vld [vmem:[%s1047_s14 + $0x38] sm:$0xff] }
  0x1d   : > { %375 = vmatpush.msra.mxu0 %v345_v5  ;;  %v429_v26 = vld [vmem:[%s1114_s5] sm:$0xff]  ;;  %v551_v28 = vsel %vm353_vm0, %v733_v27, 0  ;;  %v732_v29 = vld [vmem:[%s1047_s14 + $0x30] sm:$0xff]  ;;  %v731_v31 = vld [vmem:[%s1047_s14 + $0x28] sm:$0xff]  ;;  %p814_p0 = pneg %p813_p13 }
  0x1e   : > { %683 = vmatmul.msk.f32.vlgmr.msra.gmra.mxu0 %vm353_vm0, %v343_v7  ;;  %415 = vmatpush.msra.mxu1 %v389_v8  ;;  %v548_v30 = vsel %vm353_vm0, %v732_v29, 0  ;;  %v793_v32 = vld [vmem:[%s1113_s4] ss:$0 sm:$0xff]  ;;  %v545_v33 = vsel %vm353_vm0, %v731_v31, 0  ;;  %v729_v41 = vld [vmem:[%s1047_s14 + $0x18] sm:$0xff]  ;;  %v728_v44 = vld [vmem:[%s1047_s14 + $0x10] sm:$0xff] }
  0x1f   : > { %457 = vmatpush.msra.mxu2 %v433_v15  ;;  %553 = vmatpush.bf16.xpose.msra.mxu3 %v551_v28  ;;  %v730_v36 = vld [vmem:[%s1047_s14 + $0x20] sm:$0xff]  ;;  %v539_v43 = vsel %vm353_vm0, %v729_v41, 0  ;;  %v536_v45 = vsel %vm353_vm0, %v728_v44, 0  ;;  %v727_v46 = vld [vmem:[%s1047_s14 + $0x8] sm:$0xff]  ;;  %p819_p5 = pnand %p818_p3, %p814_p0 }
  0x20   : > { %416 = vmatpush.msra.mxu1 %v388_v9  ;;  %v542_v38 = vsel %vm353_vm0, %v730_v36, 0  ;;  %v533_v47 = vsel %vm353_vm0, %v727_v46, 0  ;;  %v726_v48 = vld [vmem:[%s1047_s14] sm:$0xff]  ;;  %s584_s14 = sshll.u32 %s329_s12, 4  ;;  %s585_s14 = int_to_ptr.vmem [resolvable:$true] %s584_s14 }
  0x21   : > { %458 = vmatpush.msra.mxu2 %v432_v16  ;;  %v530_v49 = vsel %vm353_vm0, %v726_v48, 0  ;;  %v794_v51 = vld [vmem:[%s1115_s6] ss:$0 sm:$0xff] }
  0x22   : > { %417 = vmatpush.msra.mxu1 %v387_v11 }
  0x23   : > { %459 = vmatpush.msra.mxu2 %v431_v24 }
  0x24   : > { %418 = vmatpush.msra.mxu1 %v386_v12 }
  0x25   : > { %460 = vmatpush.msra.mxu2 %v430_v25 }
  0x26   : > { %684 = vmatmul.msk.f32.gmra.mxu0 %vm353_vm0, %v344_v10  ;;  %419 = vmatpush.msra.mxu1 %v385_v13 }
  0x27   : > { %461 = vmatpush.msra.mxu2 %v429_v26  ;;  %554 = vmatpush.bf16.xpose.msra.mxu3 %v548_v30 }
  0x2f   : > { %555 = vmatpush.bf16.xpose.msra.mxu3 %v545_v33 }
  0x37   : > { %556 = vmatpush.bf16.xpose.msra.mxu3 %v542_v38 }
  0x3f   : > { %557 = vmatpush.bf16.xpose.msra.mxu3 %v539_v43 }
  0x47   : > { %558 = vmatpush.bf16.xpose.msra.mxu3 %v536_v45 }
  0x4f   : > { %559 = vmatpush.bf16.xpose.msra.mxu3 %v533_v47 }
  0x57   : > { %560 = vmatpush.bf16.xpose.msra.mxu3 %v530_v49 }
  0x9b   : > { %v377_v18 = vpop.f32.mrf.mxu0 }
  0x9c   : > { %v378_v19 = vadd.f32 %v792_v17, %v377_v18 }
  0x9e   : > { %v383_v20 = vmax.f32 %v378_v19, 0.0 }
  0xa0   : > { %685 = vmatmul.msk.f32.vlgmr.msra.gmra.mxu1 %vm397_vm1, %v383_v20 }
  0xa3   : > { %v380_v21 = vpop.f32.mrf.mxu0 }
  0xa4   : > { %v381_v22 = vadd.f32 %v792_v17, %v380_v21 }
  0xa6   : > { %v384_v23 = vmax.f32 %v381_v22, 0.0 }
  0xa8   : > { %686 = vmatmul.msk.f32.gmra.mxu1 %vm397_vm1, %v384_v23 }
 0x11d   : > { %v421_v34 = vpop.f32.mrf.mxu1 }
 0x11e   : > { %v422_v35 = vadd.f32 %v793_v32, %v421_v34 }
 0x120   : > { %v427_v37 = vmax.f32 %v422_v35, 0.0 }
 0x122   : > { %687 = vmatmul.msk.f32.vlgmr.msra.gmra.mxu2 %vm439_vm2, %v427_v37 }
 0x125   : > { %v424_v39 = vpop.f32.mrf.mxu1 }
 0x126   : > { %v425_v40 = vadd.f32 %v793_v32, %v424_v39 }
 0x128   : > { %v428_v42 = vmax.f32 %v425_v40, 0.0 }
 0x12a   : > { %688 = vmatmul.msk.f32.gmra.mxu2 %vm439_vm2, %v428_v42 }
 0x1a5   : > { %v463_v50 = vpop.f32.mrf.mxu2 }
 0x1a6   : > { %v464_v53 = vadd.f32 %v794_v51, %v463_v50 }
 0x1ad   : > { %v466_v52 = vpop.f32.mrf.mxu2 }
 0x1ae   : > { %v467_v54 = vadd.f32 %v794_v51, %v466_v52 }
 0x1b0   : > { %v469_v55 = vpack.c.bf16 %v467_v54, %v464_v53 }
 0x1b2   : > { %721 = vmatmul.msk.bf16.vlgmr.msra.gmra.mxu3 %vm353_vm0, %v469_v55 }
 0x235   : > { %v562_v56 = vpop.f32.mrf.mxu3 }
 0x236   : > { %567 = vst [vmem:[%s329_s12] sm:$0xff] %v562_v56 }
 0x23d   : > { %v564_v57 = vpop.f32.mrf.mxu3 }
 0x23e   : > { %568 = vst [vmem:[%s329_s12 + $0x8] sm:$0xff] %v564_v57 }
 0x23f   : > { %822 = shalt.err (!%p819_p5)
}
 0x240   : > { %s875_s22 = smov 128   ;;  %s876_s26 = smov 512  }
 0x241   : > { %s877_s11 = smov 8  }
 0x242   : > { %734 = dma.vmem_to_hbm [thread:$0]  (%p963_p4), %s585_s14, 256, %s587_s16, %s570_s19, %s875_s22, %s876_s26, %s877_s11  }
 0x243 PF: > { %p740_p6 = scmp.ge.s32.totalorder %s873_s10, 2  ;;  %s601_s0 = sand.u32 1, %s853_s27  }
 0x244   : > { %s602_s12 = scalar_lea.sflag [#allocation3], %s601_s0 }
 0x245   : > { %p737_p7 = pnand %p740_p6, %p970_p8 }
 0x247   : > { %p738_p9 = pneg %p737_p7 }
 0x249   : > { %848 = dma.done.wait (%p738_p9), %s602_s12, 256  }
 0x24a   : > { %850 = vsyncadd (%p738_p9), %s602_s12, 4294967040  ;;  %s21_s10 = sadd.s32 1, %s873_s10   ;;  %s1122_s27 = smov %s857_s28 }
 0x24b   : > { %p18_p10 = scmp.ge.s32.totalorder %s21_s10, 6   ;;  %s1123_s28 = smov %s861_s29 }
 0x24c   : > { %s1124_s29 = smov %s976_s18  ;;  %s1125_s30 = smov %s869_s9 }
 0x24d   : > { %s1126_s9 = smov %s1128_s13  ;;  %20 = sbr.rel (!%p18_p10) target bundleno = 6 (0x6), region = 90 }
 0x252   :  { %608 = vsyncpa [#allocation3], 1 }
 0x253   :  { %610 = vsyncpa [#allocation3 + $0x1], 1 }

</bundles_post_ra>
